<compile_context>
chip_gen: v6e
topology: v6e:2x2x1
jax: 0.10.0
libtpu: 0.0.40
codegen_flags: <defaults>
</compile_context>

<pallas_src>
import functools

import jax
import jax.numpy as jnp
from jax.experimental import pallas as pl
from jax.experimental.pallas import tpu as pltpu

_NPAD = 128  # lane-dense padded output width (true logit width is 2)


def _el_kernel(n_out, bidx_ref, eidx_ref, brow_ref, erow_ref, cls_ref,
               conv_w_ref, conv_b_ref, lin_w_ref, lin_b_ref, out_ref):
    # Scalar-prefetch refs are consumed by the BlockSpec index_maps only.
    del bidx_ref, eidx_ref

    # Gathered bert rows for this batch element (bf16 -> f32, just 2*H elems).
    begin_vec = brow_ref[0].astype(jnp.float32)   # [1, H]
    end_vec = erow_ref[0].astype(jnp.float32)     # [1, H]
    cls = cls_ref[0]                              # [1, H] f32

    # cat((cls, begin_vec, end_vec), dim=1).unsqueeze(-1) + 1x1 Conv2d(3->1)
    # == per-element weighted sum of the three channel vectors + scalar bias.
    w0 = conv_w_ref[0]
    w1 = conv_w_ref[1]
    w2 = conv_w_ref[2]
    cb = conv_b_ref[0]
    conv_out = w0 * cls + w1 * begin_vec + w2 * end_vec + cb   # [1, H]
    relu_out = jnp.maximum(conv_out, 0.0)                      # F.relu

    # Linear(768 -> n_out) on the bf16 MXU path (single pass, f32 accumulate).
    # Weight is padded to 128 output lanes so the store is lane-dense; the
    # wrapper slices [:, :n_out].
    logits = jnp.dot(relu_out.astype(jnp.bfloat16), lin_w_ref[...],
                     preferred_element_type=jnp.float32) + lin_b_ref[...]

    sig = jax.nn.sigmoid(logits)                               # [1, 128], in (0,1)

    # n_out-way softmax over the real lanes.  Sigmoid output is bounded in
    # (0, 1), so exp cannot overflow -> no max-subtraction needed.  Padded
    # lanes are zeroed and sliced away in the wrapper.
    lane = jax.lax.broadcasted_iota(jnp.int32, sig.shape, 1)
    e = jnp.where(lane < n_out, jnp.exp(sig), 0.0)
    out_ref[0] = e / jnp.sum(e, axis=-1, keepdims=True)


def el_model_version15_forward(bert_out, clsout, begin, end,
                               conv_w, conv_b, lin_w, lin_b):
    B, S, H = bert_out.shape
    N = lin_w.shape[1]  # 2

    # One-hot indicator masks -> token indices for the scalar-prefetch gather.
    # TODO(synk): assumes begin/end are 0/1 single-token indicators; arbitrary
    # (multi-token / soft) masks require the streamed masked-sum variant.
    begin_idx = jnp.argmax(begin, axis=-1).astype(jnp.int32)
    end_idx = jnp.argmax(end, axis=-1).astype(jnp.int32)

    # Present operands with a unit middle dim so each block's trailing two dims
    # equal the full array dims (clean (sublane, lane) layout, no padding).
    bert_rows = jnp.reshape(bert_out, (B * S, 1, H))              # bf16, free reshape
    cls3 = jnp.reshape(clsout.astype(jnp.float32), (B, 1, H))

    # Padded (lane-dense) Linear weight/bias; weight resident in VMEM as bf16.
    lin_w_p = jnp.zeros((H, _NPAD), jnp.bfloat16).at[:, :N].set(
        lin_w.astype(jnp.bfloat16))
    lin_b_p = jnp.zeros((1, _NPAD), jnp.float32).at[:, :N].set(
        jnp.reshape(lin_b, (1, N)).astype(jnp.float32))

    kernel = functools.partial(_el_kernel, N)

    itemsize = bert_out.dtype.itemsize
    cost = pl.CostEstimate(
        flops=B * (2 * H * _NPAD + 10 * H),
        transcendentals=B * 2 * _NPAD,
        bytes_accessed=(B * (2 * H * itemsize + H * 4 + _NPAD * 4)
                        + H * _NPAD * 2 + _NPAD * 4),
    )

    out = pl.pallas_call(
        kernel,
        out_shape=jax.ShapeDtypeStruct((B, 1, _NPAD), jnp.float32),
        grid_spec=pltpu.PrefetchScalarGridSpec(
            num_scalar_prefetch=2,          # begin_idx, end_idx -> SMEM
            grid=(B,),
            in_specs=[
                # Data-dependent row gather: block index = b*S + idx[b].
                pl.BlockSpec((1, 1, H), lambda b, bi, ei: (b * S + bi[b], 0, 0)),
                pl.BlockSpec((1, 1, H), lambda b, bi, ei: (b * S + ei[b], 0, 0)),
                pl.BlockSpec((1, 1, H), lambda b, bi, ei: (b, 0, 0)),      # cls
                pl.BlockSpec(memory_space=pltpu.MemorySpace.SMEM),         # conv_w [3]
                pl.BlockSpec(memory_space=pltpu.MemorySpace.SMEM),         # conv_b [1]
                pl.BlockSpec((H, _NPAD), lambda b, bi, ei: (0, 0)),        # lin_w (resident)
                pl.BlockSpec((1, _NPAD), lambda b, bi, ei: (0, 0)),        # lin_b (resident)
            ],
            out_specs=pl.BlockSpec((1, 1, _NPAD), lambda b, bi, ei: (b, 0, 0)),
        ),
        compiler_params=pltpu.CompilerParams(
            dimension_semantics=("parallel",)),
        cost_estimate=cost,
    )(begin_idx, end_idx, bert_rows, bert_rows, cls3,
      conv_w.astype(jnp.float32), conv_b.astype(jnp.float32),
      lin_w_p, lin_b_p)

    return jnp.reshape(out, (B, _NPAD))[:, :N]


def reference_forward(bert_out, clsout, begin, end, conv_w, conv_b, lin_w, lin_b):
    """Pure-JAX reference mirroring the PyTorch module (f32 math, HIGHEST dot)."""
    bert = bert_out.astype(jnp.float32)
    begin_vec = jnp.sum(bert * begin.astype(jnp.float32)[..., None], axis=1)
    end_vec = jnp.sum(bert * end.astype(jnp.float32)[..., None], axis=1)
    conv_out = (conv_w[0] * clsout + conv_w[1] * begin_vec
                + conv_w[2] * end_vec + conv_b[0])
    relu_out = jnp.maximum(conv_out, 0.0)
    logits = jnp.dot(relu_out, lin_w,
                     precision=jax.lax.Precision.HIGHEST) + jnp.reshape(lin_b, (1, -1))
    sig = jax.nn.sigmoid(logits)
    return jax.nn.softmax(sig, axis=-1)


if __name__ == "__main__":
    B, S, H = 2, 8, 768

    key = jax.random.PRNGKey(0)
    k1, k2, k3, k4, k5, k6 = jax.random.split(key, 6)

    # Synthetic stand-ins for BERT outputs; bert_out stays bf16 end-to-end so
    # both kernel and reference see the identical values.
    bert_out = jax.random.normal(k1, (B, S, H), dtype=jnp.float32).astype(jnp.bfloat16)
    clsout = jax.random.normal(k2, (B, H), dtype=jnp.float32)

    # begin / end are one-hot per-token indicator masks over the sequence.
    begin_idx = jax.random.randint(k3, (B,), 0, S)
    end_idx = jax.random.randint(k4, (B,), 0, S)
    begin = jax.nn.one_hot(begin_idx, S, dtype=jnp.float32)
    end = jax.nn.one_hot(end_idx, S, dtype=jnp.float32)

    # Conv2d(3,1,1) -> 3 weights + 1 bias; Linear(768,2) -> [H,2] weight
    # (pre-transposed) + [2] bias.
    conv_w = jax.random.normal(k5, (3,), dtype=jnp.float32) * 0.5
    conv_b = jnp.array([0.1], dtype=jnp.float32)
    lin_w = jax.random.normal(k6, (H, 2), dtype=jnp.float32) * 0.02
    lin_b = jnp.array([0.01, -0.01], dtype=jnp.float32)

    out = el_model_version15_forward(bert_out, clsout, begin, end,
                                     conv_w, conv_b, lin_w, lin_b)
    out = jax.block_until_ready(out)

    ref = reference_forward(bert_out, clsout, begin, end,
                            conv_w, conv_b, lin_w, lin_b)
    assert out.shape == (B, 2), out.shape
    # The kernel runs the 768-deep Linear on the single-pass bf16 MXU path
    # (per perf guidance) while the reference uses f32 HIGHEST, so tolerances
    # are sized for bf16-class rounding of that dot (~1e-4 on the softmax).
    assert jnp.allclose(out, ref, atol=1e-3, rtol=1e-3), (out, ref)

    print("KERNEL_OK")
</pallas_src>

<mosaic_0001>
module attributes {stable_mosaic.version = 11 : i64} {
  func.func @_el_kernel(%arg0: i32, %arg1: memref<2xi32, #tpu.memory_space<smem>>, %arg2: memref<2xi32, #tpu.memory_space<smem>>, %arg3: memref<1x1x768xbf16, #tpu.memory_space<vmem>>, %arg4: memref<1x1x768xbf16, #tpu.memory_space<vmem>>, %arg5: memref<1x1x768xf32, #tpu.memory_space<vmem>>, %arg6: memref<3xf32, #tpu.memory_space<smem>>, %arg7: memref<1xf32, #tpu.memory_space<smem>>, %arg8: memref<768x128xbf16, #tpu.memory_space<vmem>>, %arg9: memref<1x128xf32, #tpu.memory_space<vmem>>, %arg10: memref<1x1x128xf32, #tpu.memory_space<vmem>>) attributes {dimension_semantics = [#tpu.dimension_semantics<parallel>], iteration_bounds = array<i64: 2>, scalar_prefetch = 2 : i64, scratch_operands = 0 : i64, tpu.core_type = #tpu.core_type<tc>, window_params = [{transform_indices = @transform_0, window_bounds = array<i64: 1, 1, 768>}, {transform_indices = @transform_1, window_bounds = array<i64: 1, 1, 768>}, {transform_indices = @transform_2, window_bounds = array<i64: 1, 1, 768>}, {transform_indices = @transform_3, window_bounds = array<i64: 3>}, {transform_indices = @transform_4, window_bounds = array<i64: 1>}, {pipeline_mode = #tpu.pipeline_mode<synchronous>, transform_indices = @transform_5, window_bounds = array<i64: 768, 128>}, {pipeline_mode = #tpu.pipeline_mode<synchronous>, transform_indices = @transform_6, window_bounds = array<i64: 1, 128>}, {transform_indices = @transform_7, window_bounds = array<i64: 1, 1, 128>}]} {
    %c0 = arith.constant 0 : index
    %c0_0 = arith.constant 0 : index
    %c0_1 = arith.constant 0 : index
    %0 = vector.load %arg3[%c0, %c0_0, %c0_1] : memref<1x1x768xbf16, #tpu.memory_space<vmem>>, vector<1x1x768xbf16>
    %1 = vector.shape_cast %0 : vector<1x1x768xbf16> to vector<1x768xbf16>
    %2 = arith.extf %1 : vector<1x768xbf16> to vector<1x768xf32>
    %c0_2 = arith.constant 0 : index
    %c0_3 = arith.constant 0 : index
    %c0_4 = arith.constant 0 : index
    %3 = vector.load %arg4[%c0_2, %c0_3, %c0_4] : memref<1x1x768xbf16, #tpu.memory_space<vmem>>, vector<1x1x768xbf16>
    %4 = vector.shape_cast %3 : vector<1x1x768xbf16> to vector<1x768xbf16>
    %5 = arith.extf %4 : vector<1x768xbf16> to vector<1x768xf32>
    %c0_5 = arith.constant 0 : index
    %c0_6 = arith.constant 0 : index
    %c0_7 = arith.constant 0 : index
    %6 = vector.load %arg5[%c0_5, %c0_6, %c0_7] : memref<1x1x768xf32, #tpu.memory_space<vmem>>, vector<1x1x768xf32>
    %7 = vector.shape_cast %6 : vector<1x1x768xf32> to vector<1x768xf32>
    %c0_8 = arith.constant 0 : index
    %8 = memref.load %arg6[%c0_8] : memref<3xf32, #tpu.memory_space<smem>>
    %c1 = arith.constant 1 : index
    %9 = memref.load %arg6[%c1] : memref<3xf32, #tpu.memory_space<smem>>
    %c2 = arith.constant 2 : index
    %10 = memref.load %arg6[%c2] : memref<3xf32, #tpu.memory_space<smem>>
    %c0_9 = arith.constant 0 : index
    %11 = memref.load %arg7[%c0_9] : memref<1xf32, #tpu.memory_space<smem>>
    %12 = vector.broadcast %8 : f32 to vector<1x768xf32>
    %13 = arith.mulf %12, %7 : vector<1x768xf32>
    %14 = vector.broadcast %9 : f32 to vector<1x768xf32>
    %15 = arith.mulf %14, %2 : vector<1x768xf32>
    %16 = arith.addf %13, %15 : vector<1x768xf32>
    %17 = vector.broadcast %10 : f32 to vector<1x768xf32>
    %18 = arith.mulf %17, %5 : vector<1x768xf32>
    %19 = arith.addf %16, %18 : vector<1x768xf32>
    %20 = vector.broadcast %11 : f32 to vector<1x768xf32>
    %21 = arith.addf %19, %20 : vector<1x768xf32>
    %cst = arith.constant 0.000000e+00 : f32
    %22 = vector.broadcast %cst : f32 to vector<1x768xf32>
    %23 = arith.maximumf %21, %22 : vector<1x768xf32>
    %24 = arith.truncf %23 : vector<1x768xf32> to vector<1x768xbf16>
    %c0_10 = arith.constant 0 : index
    %c0_11 = arith.constant 0 : index
    %25 = vector.load %arg8[%c0_10, %c0_11] : memref<768x128xbf16, #tpu.memory_space<vmem>>, vector<768x128xbf16>
    %cst_12 = arith.constant dense<0.000000e+00> : vector<1x128xf32>
    %26 = tpu.matmul %24, %25, %cst_12 {dimension_numbers = #tpu.dot_dimension_numbers<[1], [0], [0], [1], [0, 0, 1, 1], [], []>} : vector<1x768xbf16>, vector<768x128xbf16>, vector<1x128xf32> -> vector<1x128xf32>
    %c0_13 = arith.constant 0 : index
    %c0_14 = arith.constant 0 : index
    %27 = vector.load %arg9[%c0_13, %c0_14] : memref<1x128xf32, #tpu.memory_space<vmem>>, vector<1x128xf32>
    %28 = arith.addf %26, %27 : vector<1x128xf32>
    %29 = arith.negf %28 : vector<1x128xf32>
    %30 = math.exp %29 : vector<1x128xf32>
    %cst_15 = arith.constant 1.000000e+00 : f32
    %31 = vector.broadcast %cst_15 : f32 to vector<1x128xf32>
    %32 = arith.addf %31, %30 : vector<1x128xf32>
    %33 = arith.divf %31, %32 : vector<1x128xf32>
    %34 = tpu.iota {dimensions = array<i32: 1>} : vector<1x128xi32>
    %c2_i32 = arith.constant 2 : i32
    %35 = vector.broadcast %c2_i32 : i32 to vector<1x128xi32>
    %36 = arith.cmpi slt, %34, %35 : vector<1x128xi32>
    %37 = math.exp %33 : vector<1x128xf32>
    %cst_16 = arith.constant 0.000000e+00 : f32
    %38 = vector.broadcast %cst_16 : f32 to vector<1x128xf32>
    %39 = arith.select %36, %37, %38 : vector<1x128xi1>, vector<1x128xf32>
    %cst_17 = arith.constant dense<0.000000e+00> : vector<1xf32>
    %40 = vector.multi_reduction <add>, %39, %cst_17 [1] : vector<1x128xf32> to vector<1xf32>
    %41 = vector.shape_cast %40 : vector<1xf32> to vector<1x1xf32>
    %42 = vector.broadcast %41 : vector<1x1xf32> to vector<1x128xf32>
    %43 = arith.divf %39, %42 : vector<1x128xf32>
    %c0_18 = arith.constant 0 : index
    %c0_19 = arith.constant 0 : index
    %c0_20 = arith.constant 0 : index
    %44 = vector.load %arg10[%c0_18, %c0_19, %c0_20] : memref<1x1x128xf32, #tpu.memory_space<vmem>>, vector<1x1x128xf32>
    %45 = vector.shape_cast %44 : vector<1x1x128xf32> to vector<1x128xf32>
    %46 = vector.shape_cast %43 : vector<1x128xf32> to vector<1x1x128xf32>
    tpu.vector_store %arg10[%c0_18, %c0_19, %c0_20], %46 {strides = array<i32>} : memref<1x1x128xf32, #tpu.memory_space<vmem>>, vector<1x1x128xf32>,
    return
  }
  func.func @transform_0(%arg0: i32, %arg1: memref<2xi32, #tpu.memory_space<smem>>, %arg2: memref<2xi32, #tpu.memory_space<smem>>) -> (i32, i32, i32) {
    %c8_i32 = arith.constant 8 : i32
    %0 = arith.muli %arg0, %c8_i32 : i32
    %1 = arith.index_cast %arg0 : i32 to index
    %2 = memref.load %arg1[%1] : memref<2xi32, #tpu.memory_space<smem>>
    %3 = arith.addi %0, %2 : i32
    %c0_i32 = arith.constant 0 : i32
    %c0_i32_0 = arith.constant 0 : i32
    %c0_i32_1 = arith.constant 0 : i32
    return %3, %c0_i32, %c0_i32_0 : i32, i32, i32
  }
  func.func @transform_1(%arg0: i32, %arg1: memref<2xi32, #tpu.memory_space<smem>>, %arg2: memref<2xi32, #tpu.memory_space<smem>>) -> (i32, i32, i32) {
    %c8_i32 = arith.constant 8 : i32
    %0 = arith.muli %arg0, %c8_i32 : i32
    %1 = arith.index_cast %arg0 : i32 to index
    %2 = memref.load %arg2[%1] : memref<2xi32, #tpu.memory_space<smem>>
    %3 = arith.addi %0, %2 : i32
    %c0_i32 = arith.constant 0 : i32
    %c0_i32_0 = arith.constant 0 : i32
    %c0_i32_1 = arith.constant 0 : i32
    return %3, %c0_i32, %c0_i32_0 : i32, i32, i32
  }
  func.func @transform_2(%arg0: i32, %arg1: memref<2xi32, #tpu.memory_space<smem>>, %arg2: memref<2xi32, #tpu.memory_space<smem>>) -> (i32, i32, i32) {
    %c0_i32 = arith.constant 0 : i32
    %c0_i32_0 = arith.constant 0 : i32
    %c0_i32_1 = arith.constant 0 : i32
    return %arg0, %c0_i32, %c0_i32_0 : i32, i32, i32
  }
  func.func @transform_3(%arg0: i32, %arg1: memref<2xi32, #tpu.memory_space<smem>>, %arg2: memref<2xi32, #tpu.memory_space<smem>>) -> i32 {
    %c0_i32 = arith.constant 0 : i32
    %c0_i32_0 = arith.constant 0 : i32
    return %c0_i32 : i32
  }
  func.func @transform_4(%arg0: i32, %arg1: memref<2xi32, #tpu.memory_space<smem>>, %arg2: memref<2xi32, #tpu.memory_space<smem>>) -> i32 {
    %c0_i32 = arith.constant 0 : i32
    %c0_i32_0 = arith.constant 0 : i32
    return %c0_i32 : i32
  }
  func.func @transform_5(%arg0: i32, %arg1: memref<2xi32, #tpu.memory_space<smem>>, %arg2: memref<2xi32, #tpu.memory_space<smem>>) -> (i32, i32) {
    %c0_i32 = arith.constant 0 : i32
    %c0_i32_0 = arith.constant 0 : i32
    %c0_i32_1 = arith.constant 0 : i32
    return %c0_i32, %c0_i32_0 : i32, i32
  }
  func.func @transform_6(%arg0: i32, %arg1: memref<2xi32, #tpu.memory_space<smem>>, %arg2: memref<2xi32, #tpu.memory_space<smem>>) -> (i32, i32) {
    %c0_i32 = arith.constant 0 : i32
    %c0_i32_0 = arith.constant 0 : i32
    %c0_i32_1 = arith.constant 0 : i32
    return %c0_i32, %c0_i32_0 : i32, i32
  }
  func.func @transform_7(%arg0: i32, %arg1: memref<2xi32, #tpu.memory_space<smem>>, %arg2: memref<2xi32, #tpu.memory_space<smem>>) -> (i32, i32, i32) {
    %c0_i32 = arith.constant 0 : i32
    %c0_i32_0 = arith.constant 0 : i32
    %c0_i32_1 = arith.constant 0 : i32
    return %arg0, %c0_i32, %c0_i32_0 : i32, i32, i32
  }
}

</mosaic_0001>

<bundles_post_ra>
// kernel: tpu_custom_call.1
= control target key start
LH: loop header
LB: loop body
LE: loop exit
PB: predicated region body
PF: predicated region fallthrough
CT: control target
= control target key end

     0   :  { %s1740_s0 = inlined_call_operand.vmem [shape: s32[2], index: 0, kind: input, shape index: {}]   ;;  %s1741_s2 = inlined_call_operand.vmem [shape: bf16[16,1,768], index: 2, kind: input, shape index: {}]   ;;  %s1742_s3 = inlined_call_operand.vmem [shape: bf16[16,1,768], index: 3, kind: input, shape index: {}]   ;;  %s1743_s4 = inlined_call_operand.vmem [shape: f32[2,1,768], index: 4, kind: input, shape index: {}]   ;;  %s1744_s5 = inlined_call_operand.vmem [shape: f32[3], index: 5, kind: input, shape index: {}]   ;;  %s1745_s7 = inlined_call_operand.hbm [shape: bf16[768,128], index: 7, kind: input, shape index: {}]   ;;  %s1746_s8 = inlined_call_operand.vmem [shape: f32[1,128], index: 8, kind: input, shape index: {}]   ;;  %s1747_s9 = inlined_call_operand.hbm [shape: f32[2,1,128], index: 9, kind: output, shape index: {}]   ;;  %s1748_s1 = inlined_call_operand.vmem [shape: s32[2], index: 1, kind: input, shape index: {}]   ;;  %s1749_s6 = inlined_call_operand.<no memory space> [shape: f32[1], index: 6, kind: input, shape index: {}]  }
   0x1   :  { %s14_s11 = sshll.u32 %s1740_s0, 4  ;;  %s18_s14 = sshll.u32 %s1748_s1, 4  ;;  %s15_s11 = int_to_ptr.vmem [resolvable:$true] %s14_s11  ;;  %s19_s14 = int_to_ptr.vmem [resolvable:$true] %s18_s14 }
   0x2   :  { %s1391_s15 = scalar_lea.vmem %s15_s11, 16  ;;  %p1396_p1 = scmp.lt.s32.totalorder %s15_s11, %s15_s11 }
   0x3   :  { %p1392_p0 = scmp.ne.s32.totalorder %s15_s11, %s1391_s15  ;;  %p1397_p2 = scmp.lt.s32.totalorder %s1391_s15, %s1391_s15 }
   0x5   :  { %p1398_p3 = por %p1397_p2, %p1396_p1 }
   0x7   :  { %p1399_p4 = pnand %p1398_p3, %p1392_p0 }
   0x9   :  { %1402 = shalt.err (!%p1399_p4)  }
   0xa   :  { %s1528_s16 = smov [#allocation3]   ;;  %s1403_s17 = scalar_lea.vmem %s19_s14, 16 }
   0xb   :  { %17 = dma.vmem_to_smem %s15_s11, 16, %s1528_s16, [#allocation2] }
   0xc   :  { %p1404_p5 = scmp.ne.s32.totalorder %s19_s14, %s1403_s17  ;;  %p1408_p6 = scmp.lt.s32.totalorder %s19_s14, %s19_s14 }
   0xd   :  { %p1409_p7 = scmp.lt.s32.totalorder %s1403_s17, %s1403_s17 }
   0xf   :  { %p1410_p8 = por %p1409_p7, %p1408_p6 }
  0x11   :  { %p1411_p9 = pnand %p1410_p8, %p1404_p5 }
  0x13   :  { %1414 = shalt.err (!%p1411_p9)  }
  0x14   :  { %s1529_s0 = smov [#allocation4]   ;;  %22 = sst [smem:[#allocation5]] %s1749_s6 }
  0x15   :  { %21 = dma.vmem_to_smem %s19_s14, 16, %s1529_s0, [#allocation2] }
  0x16   :  { %1498 = dma.done.wait [#allocation2], 32 }
  0x17   :  { %1499 = vsyncadd [#allocation2], 4294967264 }
  0x18   :  { %24 = sfence }
  0x19   :  { %25 = vsyncpa [#allocation9], 0 }
  0x1a   :  { %26 = vsyncpa [#allocation7], 0 }
  0x1b   :  { %27 = vsyncpa [#allocation8], 0 }
  0x1c   :  { %29 = vsyncpa [#allocation8 + $0x1], 0  ;;  %s1595_s19 = smov 0   ;;  %s1597_s20 = smov 0  }
  0x1d   :  { %s1599_s21 = smov 0   ;;  %s1601_s22 = smov 0  }
  0x1e LB: > { %s1616_s6 = sadd.s32 4294967295, %s1526_s22   ;;  %s1129_s23 = sadd.s32 4294967294, %s1526_s22   ;;  %s1526_s22 = sphi %s1601_s22, %s1767_s22   ;;  %s1522_s21 = sphi %s1599_s21, %s1766_s21   ;;  %s1518_s20 = sphi %s1597_s20, %s1765_s20   ;;  %s1514_s19 = sphi %s1595_s19, %s1764_s19  }
  0x1f   : > { %s1620_s24 = sadd.s32 1, %s1526_s22   ;;  %s216_s25 = sadd.s32 1, %s1522_s21 }
  0x20   : > { %s213_s26 = ssub.s32 %s1526_s22, %s1620_s24  ;;  %p226_p10 = scmp.ne.s32.totalorder %s1522_s21, %s1518_s20 }
  0x21   : > { %p214_p11 = scmp.eq.s32.totalorder %s213_s26, 0  ;;  %p227_p12 = scmp.eq.s32.totalorder %s1616_s6, 1 }
  0x22   : > { %p232_p13 = scmp.ne.s32.totalorder %s1518_s20, %s1514_s19  ;;  %p233_p0 = scmp.eq.s32.totalorder %s1129_s23, 1 }
  0x23   : > { %s1631_s27 = scalar_select %p214_p11, %s1522_s21, %s216_s25  }
  0x24   : > { %p1633_p1 = por %p227_p12, %p226_p10  ;;  %p1637_p2 = por %p233_p0, %p232_p13 }
  0x25   : > { %p1134_p3 = scmp.ge.s32.totalorder %s1526_s22, 1  ;;  %p240_p4 = scmp.lt.s32.totalorder %s1526_s22, 3 }
  0x26   : > { %s1753_s28 = scalar_select %p1633_p1, 1, 0 }
  0x27   : > { %s1754_s29 = scalar_select %p1637_p2, 1, 0 }
  0x28   : > { %p1750_p5 = scmp.eq.s32.totalorder %s1616_s6, 0  ;;  %p1644_p6 = pnand %p1134_p3, %p240_p4 }
  0x29   : > { %s253_s12 = sshll.u32 %s1744_s5, 4  ;;  %s1530_s13 = smov [#allocation10]   ;;  %s254_s12 = int_to_ptr.vmem [resolvable:$true] %s253_s12 }
  0x2a   : > { %s1755_s30 = scalar_select %p1644_p6, 1, 0 }
  0x2b   : > { %p1280_p7 = pneg %p1644_p6  ;;  %s266_s14 = sshll.u32 %s1530_s13, 4  ;;  %s267_s14 = int_to_ptr.vmem [resolvable:$true] %s266_s14 }
  0x2c   : > { %s1415_s16 = scalar_lea.vmem %s254_s12, 16  ;;  %p1423_p13 = scmp.lt.s32.totalorder %s254_s12, %s254_s12 }
  0x2d   : > { %p1655_p8 = pnand %p1750_p5, %p1280_p7  ;;  %p1416_p9 = scmp.ne.s32.totalorder %s254_s12, %s1415_s16 }
  0x2e   : > { %p1424_p0 = scmp.lt.s32.totalorder %s1415_s16, %s1415_s16 }
  0x2f   : > { %p1417_p10 = pneg %p1655_p8 }
  0x30   : > { %p1425_p3 = por %p1424_p0, %p1423_p13 }
  0x31   : > { %p1418_p11 = pnand %p1417_p10, %p1416_p9 }
  0x33   : > { %p1419_p12 = pneg %p1418_p11 }
  0x35   : > { %p1426_p4 = pnand %p1425_p3, %p1419_p12 }
  0x37   : > { %1429 = shalt.err (!%p1426_p4)
}
  0x38   : > { %s1531_s17 = smov [#allocation6]   ;;  %s1441_s0 = scalar_lea.vmem %s267_s14, 6144 }
  0x39   : > { %1283 = dma.vmem_to_smem (!%p1655_p8), %s254_s12, 16, %s1531_s17, [#allocation9]  }
  0x3a   : > { %p1442_p7 = scmp.ne.s32.totalorder %s267_s14, %s1441_s0  ;;  %p1449_p1 = scmp.lt.s32.totalorder %s267_s14, %s267_s14 }
  0x3b   : > { %p1450_p6 = scmp.lt.s32.totalorder %s1441_s0, %s1441_s0 }
  0x3c   : > { %p1444_p5 = pnand %p1442_p7, %p1417_p10 }
  0x3d   : > { %p1451_p9 = por %p1450_p6, %p1449_p1 }
  0x3e   : > { %p1445_p2 = pneg %p1444_p5 }
  0x40   : > { %p1452_p11 = pnand %p1451_p9, %p1445_p2 }
  0x42   : > { %1455 = shalt.err (!%p1452_p11)
}
  0x43   : > { %s1532_s1 = smov 64   ;;  %s1533_s18 = smov 4  }
  0x44   : > { %1286 = dma.hbm_to_vmem [thread:$0]  (!%p1655_p8), %s1745_s7, 6144, %s267_s14, [#allocation7], %s1532_s1, %s1532_s1, %s1533_s18  }
  0x45   : > { %p1757_p12 = scmp.ne.s32.totalorder %s1755_s30, 0 }
  0x46   : > { %p1758_p13 = scmp.eq.s32.totalorder (!%p1757_p12), %s1616_s6, 0 }
  0x47   : > { %318 = sbr.rel (%p1757_p12) target bundleno = 567 (0x237), region = 48 }
  0x4c   : > { %1501 = dma.done.wait (%p1758_p13), [#allocation9], 16   ;;  %p1759_p5 = pmov %p1758_p13 }
  0x4e   : > { %1503 = vsyncadd (%p1759_p5), [#allocation9], 4294967280  ;;  %p1760_p1 = pmov %p1759_p5 }
  0x50   : > { %1505 = dma.done.wait (%p1760_p1), [#allocation7], 6144   ;;  %p1761_p2 = pmov %p1760_p1 }
  0x52   : > { %1507 = vsyncadd (%p1761_p2), [#allocation7], 4294961152 }
  0x53   : > { %328 = sfence }
  0x54   : > { %v1335_v0 = vld [vmem:[#allocation10 + $0x78] sm:$0xff]   ;;  %v1338_v3 = vld [vmem:[#allocation10 + $0x70] sm:$0xff]   ;;  %s368_s26 = sld [smem:[#allocation3 + %s1616_s6]]  ;;  %v1342_v7 = vld [vmem:[#allocation10 + $0x68] sm:$0xff]   ;;  %s1141_s10 = sshll.u32 %s1616_s6, 3  ;;  %v413_v28 = vlaneseq  ;;  %vm1006_vm1 = vcmask 1040384  }
  0x55   : > { %v1336_v1 = vld [vmem:[#allocation10 + $0x38] sm:$0xff]   ;;  %1201 = vmatprep.subr.bf16.mxu0 %v1335_v0  ;;  %v1340_v5 = vld [vmem:[#allocation10 + $0x30] sm:$0xff]   ;;  %s378_s30 = sld [smem:[#allocation4 + %s1616_s6]]  ;;  %v1344_v9 = vld [vmem:[#allocation10 + $0x28] sm:$0xff]   ;;  %p387_p10 = scmp.lt.s32.totalorder %s1616_s6, 1 }
  0x56   : > { %v1337_v2 = vld [vmem:[#allocation10 + $0xf8] sm:$0xff]   ;;  %1202 = vmatpush3.bf16.msra.mxu0 %v1336_v1  ;;  %v1341_v6 = vld [vmem:[#allocation10 + $0xf0] sm:$0xff]   ;;  %v1345_v10 = vld [vmem:[#allocation10 + $0xe8] sm:$0xff]   ;;  %v1690_v33 = vshrl.u32 %v413_v28, 7  ;;  %v1534_v37 = vmov 1966171168  }
  0x57   : > { %1223 = vmatprep.subr.bf16.mxu1 %v1337_v2  ;;  %v1339_v4 = vld [vmem:[#allocation10 + $0xb8] sm:$0xff]   ;;  %1203 = vmatprep.subr.bf16.mxu0 %v1338_v3  ;;  %v1343_v8 = vld [vmem:[#allocation10 + $0xb0] sm:$0xff]   ;;  %v1346_v11 = vld [vmem:[#allocation10 + $0x60] sm:$0xff]   ;;  %s388_s15 = scalar_select %p387_p10, %s1616_s6, 1  ;;  %v411_v38 = vunpack.c.l.s4 %v1534_v37 }
  0x58   : > { %1224 = vmatpush3.bf16.msra.mxu1 %v1339_v4  ;;  %v1347_v12 = vld [vmem:[#allocation10 + $0xa8] sm:$0xff]   ;;  %v1348_v13 = vld [vmem:[#allocation10 + $0x20] sm:$0xff]   ;;  %v1350_v15 = vld [vmem:[#allocation10 + $0x58] sm:$0xff]   ;;  %v459_v63 = vsub.s32 1, %v1690_v33  ;;  %v455_v1 = vsub.s32 0, %v1690_v33  ;;  %v467_v2 = vsub.s32 3, %v1690_v33 }
  0x59   : > { %1225 = vmatprep.subr.bf16.mxu1 %v1341_v6  ;;  %v1349_v14 = vld [vmem:[#allocation10 + $0xe0] sm:$0xff]   ;;  %v1352_v17 = vld [vmem:[#allocation10 + $0x18] sm:$0xff]   ;;  %v1354_v19 = vld [vmem:[#allocation10 + $0x50] sm:$0xff]   ;;  %s1269_s25 = smul.u32 6, %s388_s15  ;;  %v412_v41 = vunpack.c.0.s8 %v411_v38  ;;  %v463_v3 = vsub.s32 2, %v1690_v33  ;;  %v475_v4 = vsub.s32 5, %v1690_v33 }
  0x5a   : > { %1204 = vmatpush3.bf16.msra.mxu0 %v1340_v5  ;;  %s369_s11 = sadd.s32 %s1141_s10, %s368_s26  ;;  %v1351_v16 = vld [vmem:[#allocation10 + $0xa0] sm:$0xff]   ;;  %v1353_v18 = vld [vmem:[#allocation10 + $0xd8] sm:$0xff]   ;;  %v1356_v21 = vld [vmem:[#allocation10 + $0x10] sm:$0xff]   ;;  %s399_s26 = sld [smem:[#allocation6]] }
  0x5b   : > { %1205 = vmatprep.subr.bf16.mxu0 %v1342_v7  ;;  %s379_s12 = sadd.s32 %s1141_s10, %s378_s30  ;;  %p370_p6 = scmp.lt.s32.totalorder %s369_s11, 15  ;;  %v1355_v20 = vld [vmem:[#allocation10 + $0x98] sm:$0xff]   ;;  %v1357_v22 = vld [vmem:[#allocation10 + $0xd0] sm:$0xff]   ;;  %v1358_v23 = vld [vmem:[#allocation10 + $0x48] sm:$0xff]   ;;  %v415_v45 = vsub.s32 %v412_v41, %v1690_v33 }
  0x5c   : > { %1226 = vmatpush3.bf16.msra.mxu1 %v1343_v8  ;;  %p380_p8 = scmp.lt.s32.totalorder %s379_s12, 15  ;;  %v1359_v24 = vld [vmem:[#allocation10 + $0x90] sm:$0xff]   ;;  %v1360_v25 = vld [vmem:[#allocation10 + $0x8] sm:$0xff]   ;;  %v1362_v27 = vld [vmem:[#allocation10 + $0x40] sm:$0xff]   ;;  %s1143_s30 = sld [smem:[#allocation6 + $0x1]] }
  0x5d   : > { %1227 = vmatprep.subr.bf16.mxu1 %v1345_v10  ;;  %s1769_s11 = smov (!%p370_p6, %s369_s11), 15  ;;  %v1361_v26 = vld [vmem:[#allocation10 + $0xc8] sm:$0xff]   ;;  %v1364_v30 = vld [vmem:[#allocation10] sm:$0xff]   ;;  %v1367_v36 = vld [vmem:[#allocation10 + $0x178] sm:$0xff]   ;;  %s1144_s10 = sld [smem:[#allocation6 + $0x2]] }
  0x5e   : > { %1206 = vmatpush3.bf16.msra.mxu0 %v1344_v9  ;;  %s1771_s12 = smov (!%p380_p8, %s379_s12), 15  ;;  %s1267_s13 = smul.u32 6, %s1769_s11  ;;  %v1363_v29 = vld [vmem:[#allocation10 + $0x88] sm:$0xff]   ;;  %v1365_v31 = vld [vmem:[#allocation10 + $0xc0] sm:$0xff]  }
  0x5f   : > { %1207 = vmatprep.subr.bf16.mxu0 %v1346_v11  ;;  %s1268_s14 = smul.u32 6, %s1771_s12  ;;  %v1366_v35 = vld [vmem:[#allocation10 + $0x80] sm:$0xff]   ;;  %s365_s17 = sand.u32 1, %s1518_s20  }
  0x60   : > { %1228 = vmatpush3.bf16.msra.mxu1 %v1347_v12  ;;  %s373_s0 = scalar_lea.vmem %s1741_s2, %s1267_s13  ;;  %s390_s13 = scalar_lea.vmem %s1743_s4, %s1269_s25  ;;  %v403_v46 = vstv %s399_s26 }
  0x61   : > { %1229 = vmatprep.subr.bf16.mxu1 %v1349_v14  ;;  %s383_s23 = scalar_lea.vmem %s1742_s3, %s1268_s14  ;;  %v392_v32 = vld [vmem:[%s373_s0] sm:$0x3f]  ;;  %s402_s14 = sld [smem:[#allocation5]] }
  0x62   : > { %1208 = vmatpush3.bf16.msra.mxu0 %v1348_v13  ;;  %v395_v34 = vld [vmem:[%s383_s23] sm:$0x3f]  ;;  %v393_v39 = vunpack.c.l.bf16 %v392_v32  ;;  %v394_v40 = vunpack.c.h.bf16 %v392_v32  ;;  %v405_v47 = vstv %s1143_s30  ;;  %v1368_v13 = vld [vmem:[#allocation10 + $0x138] sm:$0xff]   ;;  %s1194_s0 = sshll.u32 %s1616_s6, 4  ;;  %s366_s1 = scalar_lea.vmem [#allocation11], %s365_s17 }
  0x63   : > { %1209 = vmatprep.subr.bf16.mxu0 %v1350_v15  ;;  %v396_v42 = vunpack.c.l.bf16 %v395_v34  ;;  %v397_v43 = vunpack.c.h.bf16 %v395_v34  ;;  %v398_v44 = vld [vmem:[%s390_s13] sm:$0x3f]  ;;  %v427_v50 = vstv %s1144_s10  ;;  %s1026_s18 = sshll.u32 %s366_s1, 4  ;;  %s1024_s26 = scalar_lea.hbm %s1747_s9, %s1194_s0  ;;  %s1027_s18 = int_to_ptr.vmem [resolvable:$true] %s1026_s18 }
  0x64   : > { %1230 = vmatpush3.bf16.msra.mxu1 %v1351_v16  ;;  %v406_v48 = vmul.f32 %v405_v47, %v393_v39  ;;  %v407_v49 = vmul.f32 %v405_v47, %v394_v40  ;;  %v404_v53 = vmul.f32 %v403_v46, %v398_v44  ;;  %v1369_v16 = vld [vmem:[#allocation10 + $0x170] sm:$0xff]   ;;  %v1382_v34 = vld [vmem:[#allocation10 + $0x100] sm:$0xff]   ;;  %s1014_s30 = scalar_lea.sflag [#allocation8], %s365_s17  ;;  %s1456_s10 = scalar_lea.vmem %s1027_s18, 16 }
  0x65   : > { %1231 = vmatprep.subr.bf16.mxu1 %v1353_v18  ;;  %v428_v51 = vmul.f32 %v427_v50, %v396_v42  ;;  %v429_v52 = vmul.f32 %v427_v50, %v397_v43  ;;  %v1370_v18 = vld [vmem:[#allocation10 + $0x130] sm:$0xff]   ;;  %v585_v44 = vld [vmem:[%s1746_s8] sm:$0x1]  ;;  %p1457_p0 = scmp.ne.s32.totalorder %s1027_s18, %s1456_s10  ;;  %p1762_p3 = scmp.ne.s32.totalorder %s1753_s28, 0 }
  0x66   : > { %1210 = vmatpush3.bf16.msra.mxu0 %v1352_v17  ;;  %v416_v54 = vrot.slane %v406_v48, %v415_v45  ;;  %v423_v55 = vrot.slane %v407_v49, %v415_v45  ;;  %s1535_s11 = smov [#allocation11]  }
  0x67   : > { %1211 = vmatprep.subr.bf16.mxu0 %v1354_v19  ;;  %v438_v56 = vrot.slane %v428_v51, %v415_v45  ;;  %v445_v57 = vrot.slane %v429_v52, %v415_v45  ;;  %v449_v61 = vstv %s402_s14  ;;  %v1371_v19 = vld [vmem:[#allocation10 + $0x168] sm:$0xff]   ;;  %p1458_p4 = pnand %p1457_p0, %p1762_p3  ;;  %s1460_s12 = sshll.u32 %s1535_s11, 4  ;;  %s1461_s12 = int_to_ptr.vmem [resolvable:$false] %s1460_s12 }
  0x68   : > { %1232 = vmatpush3.bf16.msra.mxu1 %v1355_v20  ;;  %v424_v58 = vcombine.low %v416_v54, %v423_v55  ;;  %v1372_v20 = vld [vmem:[#allocation10 + $0x128] sm:$0xff]   ;;  %s1462_s6 = scalar_lea.vmem %s1461_s12, 32  ;;  %p1463_p9 = scmp.lt.s32.totalorder %s1027_s18, %s1461_s12 }
  0x69   : > { %1233 = vmatprep.subr.bf16.mxu1 %v1357_v22  ;;  %v446_v59 = vcombine.low %v438_v56, %v445_v57  ;;  %v1374_v22 = vld [vmem:[#allocation10 + $0x120] sm:$0xff]   ;;  %p1459_p7 = pneg %p1458_p4  ;;  %p1464_p11 = scmp.lt.s32.totalorder %s1462_s6, %s1456_s10 }
  0x6a   : > { %1212 = vmatpush3.bf16.msra.mxu0 %v1356_v21  ;;  %v426_v60 = vadd.f32 %v424_v58, %v404_v53  ;;  %v1373_v21 = vld [vmem:[#allocation10 + $0x160] sm:$0xff]  }
  0x6b   : > { %1213 = vmatprep.subr.bf16.mxu0 %v1358_v23  ;;  %v1375_v23 = vld [vmem:[#allocation10 + $0x158] sm:$0xff]   ;;  %p1465_p12 = por %p1464_p11, %p1463_p9 }
  0x6c   : > { %1234 = vmatpush3.bf16.msra.mxu1 %v1359_v24  ;;  %v448_v62 = vadd.f32 %v446_v59, %v426_v60  ;;  %v1376_v24 = vld [vmem:[#allocation10 + $0x118] sm:$0xff]   ;;  %v1001_v59 = vand.u32 127, %v413_v28 }
  0x6d   : > { %1235 = vmatprep.subr.bf16.mxu1 %v1361_v26  ;;  %v1378_v26 = vld [vmem:[#allocation10 + $0x110] sm:$0xff]   ;;  %p1466_p13 = pnand %p1465_p12, %p1459_p7 }
  0x6e   : > { %1214 = vmatpush3.bf16.msra.mxu0 %v1360_v25  ;;  %v450_v0 = vadd.f32 %v449_v61, %v448_v62  ;;  %v1377_v25 = vld [vmem:[#allocation10 + $0x150] sm:$0xff]   ;;  %vm1002_vm0 = vcmp.lt.s32.totalorder %v1001_v59, 2 }
  0x6f   : > { %1215 = vmatprep.subr.bf16.mxu0 %v1362_v27  ;;  %v1379_v27 = vld [vmem:[#allocation10 + $0x148] sm:$0xff]  }
  0x70   : > { %1236 = vmatpush3.bf16.msra.mxu1 %v1363_v29  ;;  %v451_v5 = vmax.f32 %v450_v0, 0.0  ;;  %v471_v29 = vsub.s32 4, %v1690_v33 }
  0x71   : > { %1237 = vmatprep.subr.bf16.mxu1 %v1365_v31  ;;  %v1381_v31 = vld [vmem:[#allocation10 + $0x140] sm:$0xff]  }
  0x72   : > { %1216 = vmatpush3.bf16.msra.mxu0 %v1364_v30  ;;  %v460_v6 = vrot.slane %v451_v5, %v459_v63  ;;  %v456_v7 = vrot.slane %v451_v5, %v455_v1  ;;  %v468_v8 = vrot.slane %v451_v5, %v467_v2  ;;  %v464_v9 = vrot.slane %v451_v5, %v463_v3  ;;  %v1380_v30 = vld [vmem:[#allocation10 + $0x108] sm:$0xff]  }
  0x73   : > { %1245 = vmatprep.subr.bf16.mxu0 %v1367_v36  ;;  %v476_v10 = vrot.slane %v451_v5, %v475_v4  ;;  %v472_v32 = vrot.slane %v451_v5, %v471_v29 }
  0x74   : > { %1238 = vmatpush3.bf16.msra.mxu1 %v1366_v35  ;;  %v484_v11 = vpack.c.bf16 %v460_v6, %v460_v6  ;;  %v483_v12 = vpack.c.bf16 %v456_v7, %v456_v7  ;;  %v486_v14 = vpack.c.bf16 %v468_v8, %v468_v8  ;;  %v485_v15 = vpack.c.bf16 %v464_v9, %v464_v9 }
  0x75   : > { %v488_v17 = vpack.c.bf16 %v476_v10, %v476_v10  ;;  %v487_v35 = vpack.c.bf16 %v472_v32, %v472_v32 }
  0x76   : > { %906 = vmatprep.mubr.bf16.mxu0 %v484_v11  ;;  %946 = vmatprep.mubr.bf16.mxu1 %v486_v14 }
  0x77   : > { %907 = vmatmul.mubr.bf16.vlgmr.msra.gmra.mxu0 %v483_v12  ;;  %947 = vmatmul.mubr.bf16.vlgmr.msra.gmra.mxu1 %v485_v15 }
  0x78   : > { %1246 = vmatpush3.bf16.msra.mxu0 %v1368_v13  ;;  %986 = vmatprep.mubr.bf16.mxu0 %v488_v17 }
  0x79   : > { %1247 = vmatprep.subr.bf16.mxu0 %v1369_v16 }
  0x7c   : > { %1248 = vmatpush3.bf16.msra.mxu0 %v1370_v18 }
  0x7d   : > { %1249 = vmatprep.subr.bf16.mxu0 %v1371_v19 }
  0x80   : > { %1250 = vmatpush3.bf16.msra.mxu0 %v1372_v20 }
  0x81   : > { %1251 = vmatprep.subr.bf16.mxu0 %v1373_v21 }
  0x84   : > { %1252 = vmatpush3.bf16.msra.mxu0 %v1374_v22 }
  0x85   : > { %1253 = vmatprep.subr.bf16.mxu0 %v1375_v23 }
  0x88   : > { %1254 = vmatpush3.bf16.msra.mxu0 %v1376_v24 }
  0x89   : > { %1255 = vmatprep.subr.bf16.mxu0 %v1377_v25 }
  0x8c   : > { %1256 = vmatpush3.bf16.msra.mxu0 %v1378_v26 }
  0x8d   : > { %1257 = vmatprep.subr.bf16.mxu0 %v1379_v27 }
  0x90   : > { %1258 = vmatpush3.bf16.msra.mxu0 %v1380_v30 }
  0x91   : > { %1259 = vmatprep.subr.bf16.mxu0 %v1381_v31 }
  0x94   : > { %1260 = vmatpush3.bf16.msra.mxu0 %v1382_v34 }
  0x97   : > { %987 = vmatmul.mubr.bf16.vlgmr.msra.gmra.mxu0 %v487_v35 }
 0x137   : > { %v1217_v36 = vpop.f32.mrf.mxu0  ;;  %v1239_v37 = vpop.f32.mrf.mxu1 }
 0x139   : > { %v1218_v38 = vpop.f32.mrf.mxu0  ;;  %v1240_v39 = vpop.f32.mrf.mxu1 }
 0x13a   : > { %v1219_v33 = vadd.f32 %v1218_v38, %v1217_v36  ;;  %v1241_v46 = vadd.f32 %v1240_v39, %v1239_v37 }
 0x13b   : > { %v1220_v40 = vpop.f32.mrf.mxu0  ;;  %v1242_v41 = vpop.f32.mrf.mxu1 }
 0x13c   : > { %v909_v45 = vadd.f32 %v1219_v33, %v585_v44 }
 0x13d   : > { %v1221_v42 = vpop.f32.mrf.mxu0  ;;  %v1243_v43 = vpop.f32.mrf.mxu1 }
 0x13e   : > { %v949_v49 = vadd.f32 %v1241_v46, %v909_v45 }
 0x157   : > { %v1261_v47 = vpop.f32.mrf.mxu0 }
 0x159   : > { %v1262_v48 = vpop.f32.mrf.mxu0 }
 0x15a   : > { %v1263_v50 = vadd.f32 %v1262_v48, %v1261_v47 }
 0x15b   : > { %v1264_v51 = vpop.f32.mrf.mxu0 }
 0x15c   : > { %v989_v52 = vadd.f32 %v1263_v50, %v949_v49 }
 0x15d   : > { %v1265_v53 = vpop.f32.mrf.mxu0 }
 0x15e   : > { %v1193_v54 = vmul.f32 -1.442695, %v989_v52 }
 0x160   : > { %1383 = vpow2.f32 %v1193_v54 }
 0x16d   : > { %v1384_v55 = vpop.eup %1383 }
 0x16e   : > { %v997_v56 = vadd.f32 1.0, %v1384_v55 }
 0x170   : > { %1385 = vrcp.f32 %v997_v56 }
 0x17d   : > { %v1386_v57 = vpop.eup %1385 }
 0x17e   : > { %v1003_v58 = vmul.f32 1.442695, %v1386_v57 }
 0x180   : > { %1387 = vpow2.f32 %v1003_v58 }
 0x18d   : > { %v1388_v60 = vpop.eup %1387 }
 0x18e   : > { %v1005_v61 = vsel %vm1002_vm0, %v1388_v60, 0.0 }
 0x18f   : > { %v1007_v62 = vsel %vm1006_vm1, %v1005_v61, 0.0 }
 0x190   : > { %1008 = vadd.xlane.f32.xlu0 %v1007_v62 }
 0x219   : > { %v1009_v63 = vpop.xlane.xlu0 %1008 }
 0x21a   : > { %1389 = vrcp.f32 %v1009_v63 }
 0x227   : > { %v1390_v0 = vpop.eup %1389 }
 0x228   : > { %v1011_v1 = vmul.f32 %v1390_v0, %v1005_v61 }
 0x22a   : > { %1012 = vst [vmem:[%s366_s1] sm:$0x1] %v1011_v1 }
 0x22b   : > { %1469 = shalt.err (!%p1466_p13)
}
 0x22c   : > { %s1470_s13 = scalar_lea.hbm %s1024_s26, 16  ;;  %s1474_s16 = scalar_lea.hbm %s1747_s9, 32 }
 0x22d   : > { %p1471_p5 = scmp.ne.s32.totalorder %s1024_s26, %s1470_s13  ;;  %p1475_p6 = scmp.lt.s32.totalorder %s1024_s26, %s1747_s9 }
 0x22e   : > { %p1476_p8 = scmp.lt.s32.totalorder %s1474_s16, %s1470_s13 }
 0x22f   : > { %p1472_p1 = pnand %p1471_p5, %p1762_p3 }
 0x230   : > { %p1477_p10 = por %p1476_p8, %p1475_p6 }
 0x231   : > { %p1473_p2 = pneg %p1472_p1 }
 0x233   : > { %p1478_p0 = pnand %p1477_p10, %p1473_p2 }
 0x235   : > { %1481 = shalt.err (!%p1478_p0)
}
 0x236   : > { %1278 = dma.vmem_to_hbm [thread:$0]  (%p1762_p3), %s1027_s18, 16, %s1024_s26, %s1014_s30  }
 0x237 PF: > { %p1295_p4 = scmp.ge.s32.totalorder %s1526_s22, 2  ;;  %s1038_s1 = sand.u32 1, %s1514_s19  }
 0x238   : > { %p1763_p7 = scmp.ne.s32.totalorder %s1754_s29, 0  ;;  %s1039_s23 = scalar_lea.sflag [#allocation8], %s1038_s1 }
 0x23a   : > { %p1288_p9 = pnand %p1295_p4, %p1763_p7 }
 0x23c   : > { %p1289_p11 = pneg %p1288_p9 }
 0x23e   : > { %1509 = dma.done.wait (%p1289_p11), %s1039_s23, 16  }
 0x23f   : > { %1511 = vsyncadd (%p1289_p11), %s1039_s23, 4294967280  ;;  %p32_p12 = scmp.ge.s32.totalorder %s1620_s24, 4   ;;  %s1764_s19 = smov %s1518_s20 }
 0x240   : > { %s1765_s20 = smov %s1522_s21  ;;  %s1766_s21 = smov %s1631_s27 }
 0x241   : > { %s1767_s22 = smov %s1620_s24  ;;  %34 = sbr.rel (!%p32_p12) target bundleno = 30 (0x1e), region = 99 }
 0x246   :  { %1043 = vsyncpa [#allocation7], 1 }
 0x247   :  { %1045 = vsyncpa [#allocation7 + $0x1], 1 }
 0x248   :  { %1046 = vsyncpa [#allocation8], 1 }
 0x249   :  { %1048 = vsyncpa [#allocation8 + $0x1], 1 }
 0x24a   :  { %1049 = vsyncpa [#allocation9], 1 }
 0x24b   :  { %1051 = vsyncpa [#allocation9 + $0x1], 1 }

</bundles_post_ra>
